<compile_context>
chip_gen: v7x
topology: tpu7x:2x2x1
jax: 0.10.0
libtpu: 0.0.40
codegen_flags: <defaults>
</compile_context>

<pallas_src>
import functools

import jax
import jax.numpy as jnp
from jax import lax
from jax.experimental import pallas as pl
from jax.experimental.pallas import tpu as pltpu


def _mhln_kernel(x_ref, wb_ref, o_ref, *, eps, dh, tpr, has_bias):
    # x_ref / o_ref: (HB, TR, LANE) block, LANE = tpr * dh.
    # wb_ref: (HB, 1|2, LANE) f32 resident scale (+ optional bias) for these heads.
    inv_dh = 1.0 / dh
    for j in range(tpr):                           # static unroll over folded tokens
        sl = slice(j * dh, (j + 1) * dh)           # static lane slice
        c = x_ref[:, :, sl].astype(jnp.float32)    # (HB, TR, DH) f32 (per-slice cast)
        mean = jnp.sum(c, axis=-1, keepdims=True) * inv_dh
        d = c - mean
        var = jnp.sum(d * d, axis=-1, keepdims=True) * inv_dh   # two-pass, biased
        y = d * lax.rsqrt(var + eps)
        y = y * wb_ref[:, 0:1, sl]
        if has_bias:
            y = y + wb_ref[:, 1:2, sl]
        o_ref[:, :, sl] = y.astype(o_ref.dtype)    # direct per-slice store (no concat)


def _target_block_bytes(itemsize):
    """HBM-bound kernel: per-block byte target by TPU generation and dtype."""
    try:
        kind = jax.devices()[0].device_kind.lower()
    except Exception:
        kind = ""
    older = any(t in kind for t in ("v2", "v3", "v4", "v5"))
    gen_target = (2 << 20) if older else (4 << 20)     # v6e / v7x: bigger blocks
    return min(gen_target, (1 << 20) * itemsize)        # cap elems -> bounded f32 temps


def _pick_divisor(n, target):
    """Largest divisor of n that is <= target (at least 1)."""
    target = max(1, min(n, int(target)))
    for d in range(target, 0, -1):
        if n % d == 0:
            return d
    return 1


def _pick_row_tile(num_rows, rows_target, sublane):
    """Largest sublane-aligned divisor of num_rows <= rows_target (None -> pad)."""
    rows_target = max(1, min(num_rows, int(rows_target)))
    if rows_target == num_rows:
        return num_rows
    for step in (sublane, 8):                      # prefer native packing, Mosaic needs 8
        start = rows_target - rows_target % step
        for d in range(start, 0, -step):
            if num_rows % d == 0:
                return d
    return None


def multi_head_layer_norm(x, affine_weight, affine_bias=None, *,
                          eps=1e-5, residual_weight=True):
    """Pallas TPU implementation of MultiHeadLayerNorm.forward."""
    B, NH, S, DH = x.shape
    assert affine_weight.shape == (NH * DH,)
    if affine_bias is not None:
        assert affine_bias.shape == (NH * DH,)

    itemsize = jnp.dtype(x.dtype).itemsize
    sublane = max(8, 32 // itemsize)               # f32: 8, bf16: 16, int8/fp8: 32

    # Lane-dense token folding: pack several tokens into one 128-wide lane row.
    if DH < 128 and 128 % DH == 0 and S % (128 // DH) == 0:
        tpr = 128 // DH
    else:
        tpr = 1                                    # fallback: correct, may be lane-sparse
    lane = tpr * DH
    num_rows = S // tpr
    nh_total = B * NH

    x_flat = x.reshape(nh_total, num_rows, lane)   # contiguous regrouping of (S, DH)

    # Effective per-channel scale (1 + w), lane-tiled per head and repeated over B so
    # the weight index_map simply follows the leading block index. Optional bias is
    # stacked as a second row of the same tiny array.
    w = (1.0 + affine_weight) if residual_weight else affine_weight
    w = jnp.tile(w.reshape(NH, DH).astype(jnp.float32), (B, tpr))      # (B*NH, lane)
    wb = w[:, None, :]
    if affine_bias is not None:
        b = jnp.tile(affine_bias.reshape(NH, DH).astype(jnp.float32), (B, tpr))
        wb = jnp.concatenate([wb, b[:, None, :]], axis=1)              # (B*NH, 2, lane)
    nwb = wb.shape[1]

    # ---- choose block shapes (target ~2-4 MiB per DMA, generation/dtype aware).
    target_bytes = _target_block_bytes(itemsize)
    row_bytes = lane * itemsize
    padded_head_rows = -(-num_rows // sublane) * sublane   # footprint of one head's rows
    head_bytes = padded_head_rows * row_bytes

    pad_rows = 0
    if head_bytes >= target_bytes:
        # Large heads: one (batch, head) per block, tile the folded token rows.
        hb = 1
        rows_target = max(sublane, target_bytes // row_bytes)
        tr = _pick_row_tile(num_rows, rows_target, sublane)
        if tr is None:                                     # rare: make rows tileable
            pad_rows = (-num_rows) % sublane
            tr = _pick_row_tile(num_rows + pad_rows, rows_target, sublane)
            tr = tr or (num_rows + pad_rows)
    else:
        # Small heads (decode-like): fold several whole (batch, head) pairs per block.
        tr = num_rows
        hb = _pick_divisor(nh_total, max(1, target_bytes // max(head_bytes, 1)))
        if nh_total // hb < 2 and nh_total >= 2:           # >=2 lead blocks for megacore
            hb = _pick_divisor(nh_total, nh_total // 2)

    if pad_rows:
        # Zero rows give finite stats (var=0 -> rsqrt(eps)), and are sliced off below.
        x_flat = jnp.pad(x_flat, ((0, 0), (0, pad_rows), (0, 0)))
    rows_total = num_rows + pad_rows
    grid = (nh_total // hb, rows_total // tr)

    # ---- explicit scoped-VMEM budget: double-buffered in/out blocks, a few lane- and
    # sublane-padded f32 working tiles, the resident weight block and slack.
    lane128 = -(-lane // 128) * 128
    dh128 = -(-DH // 128) * 128
    tr_pad = -(-tr // sublane) * sublane
    tr_pad8 = -(-tr // 8) * 8
    io_block = hb * tr_pad * lane128 * itemsize
    f32_tile = hb * tr_pad8 * dh128 * 4
    wb_block = hb * 8 * lane128 * 4
    vmem_needed = 4 * io_block + 4 * f32_tile + 2 * wb_block + (2 << 20)
    vmem_limit = int(min(48 << 20, max(16 << 20, vmem_needed)))   # <=48 MiB: safe on v7x

    nelems = B * NH * S * DH
    cost = pl.CostEstimate(
        flops=7 * nelems,
        transcendentals=B * NH * S,
        bytes_accessed=2 * nelems * itemsize + int(wb.size) * 4,
    )

    kernel = functools.partial(_mhln_kernel, eps=float(eps), dh=DH, tpr=tpr,
                               has_bias=affine_bias is not None)

    out = pl.pallas_call(
        kernel,
        out_shape=jax.ShapeDtypeStruct((nh_total, rows_total, lane), x.dtype),
        grid_spec=pltpu.PrefetchScalarGridSpec(
            num_scalar_prefetch=0,
            grid=grid,
            in_specs=[
                pl.BlockSpec((hb, tr, lane), lambda i, j: (i, j, 0)),
                pl.BlockSpec((hb, nwb, lane), lambda i, j: (i, 0, 0)),  # per-head scale/bias
            ],
            out_specs=pl.BlockSpec((hb, tr, lane), lambda i, j: (i, j, 0)),
        ),
        compiler_params=pltpu.CompilerParams(
            dimension_semantics=("parallel", "parallel"),
            vmem_limit_bytes=vmem_limit),
        cost_estimate=cost,
    )(x_flat, wb)

    if pad_rows:
        out = out[:, :num_rows, :]
    return out.reshape(B, NH, S, DH)


def _reference(x, affine_weight, affine_bias=None, *, eps=1e-5, residual_weight=True):
    # Pure-JAX reference mirroring F.group_norm semantics of the module.
    B, NH, S, DH = x.shape
    xf = x.astype(jnp.float32)
    mean = jnp.mean(xf, axis=-1, keepdims=True)
    var = jnp.mean((xf - mean) ** 2, axis=-1, keepdims=True)
    normed = (xf - mean) / jnp.sqrt(var + eps)
    w = (1.0 + affine_weight) if residual_weight else affine_weight
    out = normed * w.reshape(NH, DH)[None, :, None, :]
    if affine_bias is not None:
        out = out + affine_bias.reshape(NH, DH)[None, :, None, :]
    return out.astype(x.dtype)


if __name__ == "__main__":
    B, NH, S, DH = 2, 4, 8, 32   # small shapes consistent with the module's forward
    key = jax.random.PRNGKey(0)
    kx, kw = jax.random.split(key)

    x = jax.random.normal(kx, (B, NH, S, DH), dtype=jnp.float32)
    # Module inits affine_weight to zeros; use small random values so the
    # (1 + affine_weight) scale path is actually exercised.
    affine_weight = 0.1 * jax.random.normal(kw, (NH * DH,), dtype=jnp.float32)

    out = multi_head_layer_norm(x, affine_weight)
    out = jax.block_until_ready(out)

    ref = _reference(x, affine_weight)
    assert out.shape == (B, NH, S, DH)
    assert jnp.allclose(out, ref, atol=2e-5, rtol=2e-5), "mismatch vs reference"

    print("KERNEL_OK")
</pallas_src>

<mosaic_0001>
module attributes {stable_mosaic.version = 11 : i64} {
  func.func @_mhln_kernel(%arg0: i32, %arg1: i32, %arg2: memref<4x2x128xf32, #tpu.memory_space<vmem>>, %arg3: memref<4x1x128xf32, #tpu.memory_space<vmem>>, %arg4: memref<4x2x128xf32, #tpu.memory_space<vmem>>) attributes {dimension_semantics = [#tpu.dimension_semantics<parallel>, #tpu.dimension_semantics<parallel>], iteration_bounds = array<i64: 2, 1>, scalar_prefetch = 0 : i64, scratch_operands = 0 : i64, tpu.core_type = #tpu.core_type<tc>, window_params = [{transform_indices = @transform_0, window_bounds = array<i64: 4, 2, 128>}, {transform_indices = @transform_1, window_bounds = array<i64: 4, 1, 128>}, {transform_indices = @transform_2, window_bounds = array<i64: 4, 2, 128>}]} {
    %c0 = arith.constant 0 : index
    %c0_0 = arith.constant 0 : index
    %c0_1 = arith.constant 0 : index
    %0 = vector.load %arg2[%c0, %c0_0, %c0_1] : memref<4x2x128xf32, #tpu.memory_space<vmem>>, vector<4x2x32xf32>
    %cst = arith.constant dense<0.000000e+00> : vector<4x2xf32>
    %1 = vector.multi_reduction <add>, %0, %cst [2] : vector<4x2x32xf32> to vector<4x2xf32>
    %2 = vector.shape_cast %1 : vector<4x2xf32> to vector<4x2x1xf32>
    %cst_2 = arith.constant 3.125000e-02 : f32
    %3 = vector.broadcast %cst_2 : f32 to vector<4x2x1xf32>
    %4 = arith.mulf %2, %3 : vector<4x2x1xf32>
    %5 = vector.broadcast %4 : vector<4x2x1xf32> to vector<4x2x32xf32>
    %6 = arith.subf %0, %5 : vector<4x2x32xf32>
    %7 = arith.mulf %6, %6 : vector<4x2x32xf32>
    %cst_3 = arith.constant dense<0.000000e+00> : vector<4x2xf32>
    %8 = vector.multi_reduction <add>, %7, %cst_3 [2] : vector<4x2x32xf32> to vector<4x2xf32>
    %9 = vector.shape_cast %8 : vector<4x2xf32> to vector<4x2x1xf32>
    %cst_4 = arith.constant 3.125000e-02 : f32
    %10 = vector.broadcast %cst_4 : f32 to vector<4x2x1xf32>
    %11 = arith.mulf %9, %10 : vector<4x2x1xf32>
    %cst_5 = arith.constant 9.99999974E-6 : f32
    %12 = vector.broadcast %cst_5 : f32 to vector<4x2x1xf32>
    %13 = arith.addf %11, %12 : vector<4x2x1xf32>
    %14 = math.rsqrt %13 : vector<4x2x1xf32>
    %15 = vector.broadcast %14 : vector<4x2x1xf32> to vector<4x2x32xf32>
    %16 = arith.mulf %6, %15 : vector<4x2x32xf32>
    %c0_6 = arith.constant 0 : index
    %c0_7 = arith.constant 0 : index
    %c0_8 = arith.constant 0 : index
    %17 = vector.load %arg3[%c0_6, %c0_7, %c0_8] : memref<4x1x128xf32, #tpu.memory_space<vmem>>, vector<4x1x32xf32>
    %18 = vector.broadcast %17 : vector<4x1x32xf32> to vector<4x2x32xf32>
    %19 = arith.mulf %16, %18 : vector<4x2x32xf32>
    %c0_9 = arith.constant 0 : index
    %c0_10 = arith.constant 0 : index
    %c0_11 = arith.constant 0 : index
    %20 = vector.load %arg4[%c0_9, %c0_10, %c0_11] : memref<4x2x128xf32, #tpu.memory_space<vmem>>, vector<4x2x32xf32>
    tpu.vector_store %arg4[%c0_9, %c0_10, %c0_11], %19 {strides = array<i32>} : memref<4x2x128xf32, #tpu.memory_space<vmem>>, vector<4x2x32xf32>,
    %c0_12 = arith.constant 0 : index
    %c0_13 = arith.constant 0 : index
    %c32 = arith.constant 32 : index
    %21 = vector.load %arg2[%c0_12, %c0_13, %c32] : memref<4x2x128xf32, #tpu.memory_space<vmem>>, vector<4x2x32xf32>
    %cst_14 = arith.constant dense<0.000000e+00> : vector<4x2xf32>
    %22 = vector.multi_reduction <add>, %21, %cst_14 [2] : vector<4x2x32xf32> to vector<4x2xf32>
    %23 = vector.shape_cast %22 : vector<4x2xf32> to vector<4x2x1xf32>
    %cst_15 = arith.constant 3.125000e-02 : f32
    %24 = vector.broadcast %cst_15 : f32 to vector<4x2x1xf32>
    %25 = arith.mulf %23, %24 : vector<4x2x1xf32>
    %26 = vector.broadcast %25 : vector<4x2x1xf32> to vector<4x2x32xf32>
    %27 = arith.subf %21, %26 : vector<4x2x32xf32>
    %28 = arith.mulf %27, %27 : vector<4x2x32xf32>
    %cst_16 = arith.constant dense<0.000000e+00> : vector<4x2xf32>
    %29 = vector.multi_reduction <add>, %28, %cst_16 [2] : vector<4x2x32xf32> to vector<4x2xf32>
    %30 = vector.shape_cast %29 : vector<4x2xf32> to vector<4x2x1xf32>
    %cst_17 = arith.constant 3.125000e-02 : f32
    %31 = vector.broadcast %cst_17 : f32 to vector<4x2x1xf32>
    %32 = arith.mulf %30, %31 : vector<4x2x1xf32>
    %cst_18 = arith.constant 9.99999974E-6 : f32
    %33 = vector.broadcast %cst_18 : f32 to vector<4x2x1xf32>
    %34 = arith.addf %32, %33 : vector<4x2x1xf32>
    %35 = math.rsqrt %34 : vector<4x2x1xf32>
    %36 = vector.broadcast %35 : vector<4x2x1xf32> to vector<4x2x32xf32>
    %37 = arith.mulf %27, %36 : vector<4x2x32xf32>
    %c0_19 = arith.constant 0 : index
    %c0_20 = arith.constant 0 : index
    %c32_21 = arith.constant 32 : index
    %38 = vector.load %arg3[%c0_19, %c0_20, %c32_21] : memref<4x1x128xf32, #tpu.memory_space<vmem>>, vector<4x1x32xf32>
    %39 = vector.broadcast %38 : vector<4x1x32xf32> to vector<4x2x32xf32>
    %40 = arith.mulf %37, %39 : vector<4x2x32xf32>
    %c0_22 = arith.constant 0 : index
    %c0_23 = arith.constant 0 : index
    %c32_24 = arith.constant 32 : index
    %41 = vector.load %arg4[%c0_22, %c0_23, %c32_24] : memref<4x2x128xf32, #tpu.memory_space<vmem>>, vector<4x2x32xf32>
    tpu.vector_store %arg4[%c0_22, %c0_23, %c32_24], %40 {strides = array<i32>} : memref<4x2x128xf32, #tpu.memory_space<vmem>>, vector<4x2x32xf32>,
    %c0_25 = arith.constant 0 : index
    %c0_26 = arith.constant 0 : index
    %c64 = arith.constant 64 : index
    %42 = vector.load %arg2[%c0_25, %c0_26, %c64] : memref<4x2x128xf32, #tpu.memory_space<vmem>>, vector<4x2x32xf32>
    %cst_27 = arith.constant dense<0.000000e+00> : vector<4x2xf32>
    %43 = vector.multi_reduction <add>, %42, %cst_27 [2] : vector<4x2x32xf32> to vector<4x2xf32>
    %44 = vector.shape_cast %43 : vector<4x2xf32> to vector<4x2x1xf32>
    %cst_28 = arith.constant 3.125000e-02 : f32
    %45 = vector.broadcast %cst_28 : f32 to vector<4x2x1xf32>
    %46 = arith.mulf %44, %45 : vector<4x2x1xf32>
    %47 = vector.broadcast %46 : vector<4x2x1xf32> to vector<4x2x32xf32>
    %48 = arith.subf %42, %47 : vector<4x2x32xf32>
    %49 = arith.mulf %48, %48 : vector<4x2x32xf32>
    %cst_29 = arith.constant dense<0.000000e+00> : vector<4x2xf32>
    %50 = vector.multi_reduction <add>, %49, %cst_29 [2] : vector<4x2x32xf32> to vector<4x2xf32>
    %51 = vector.shape_cast %50 : vector<4x2xf32> to vector<4x2x1xf32>
    %cst_30 = arith.constant 3.125000e-02 : f32
    %52 = vector.broadcast %cst_30 : f32 to vector<4x2x1xf32>
    %53 = arith.mulf %51, %52 : vector<4x2x1xf32>
    %cst_31 = arith.constant 9.99999974E-6 : f32
    %54 = vector.broadcast %cst_31 : f32 to vector<4x2x1xf32>
    %55 = arith.addf %53, %54 : vector<4x2x1xf32>
    %56 = math.rsqrt %55 : vector<4x2x1xf32>
    %57 = vector.broadcast %56 : vector<4x2x1xf32> to vector<4x2x32xf32>
    %58 = arith.mulf %48, %57 : vector<4x2x32xf32>
    %c0_32 = arith.constant 0 : index
    %c0_33 = arith.constant 0 : index
    %c64_34 = arith.constant 64 : index
    %59 = vector.load %arg3[%c0_32, %c0_33, %c64_34] : memref<4x1x128xf32, #tpu.memory_space<vmem>>, vector<4x1x32xf32>
    %60 = vector.broadcast %59 : vector<4x1x32xf32> to vector<4x2x32xf32>
    %61 = arith.mulf %58, %60 : vector<4x2x32xf32>
    %c0_35 = arith.constant 0 : index
    %c0_36 = arith.constant 0 : index
    %c64_37 = arith.constant 64 : index
    %62 = vector.load %arg4[%c0_35, %c0_36, %c64_37] : memref<4x2x128xf32, #tpu.memory_space<vmem>>, vector<4x2x32xf32>
    tpu.vector_store %arg4[%c0_35, %c0_36, %c64_37], %61 {strides = array<i32>} : memref<4x2x128xf32, #tpu.memory_space<vmem>>, vector<4x2x32xf32>,
    %c0_38 = arith.constant 0 : index
    %c0_39 = arith.constant 0 : index
    %c96 = arith.constant 96 : index
    %63 = vector.load %arg2[%c0_38, %c0_39, %c96] : memref<4x2x128xf32, #tpu.memory_space<vmem>>, vector<4x2x32xf32>
    %cst_40 = arith.constant dense<0.000000e+00> : vector<4x2xf32>
    %64 = vector.multi_reduction <add>, %63, %cst_40 [2] : vector<4x2x32xf32> to vector<4x2xf32>
    %65 = vector.shape_cast %64 : vector<4x2xf32> to vector<4x2x1xf32>
    %cst_41 = arith.constant 3.125000e-02 : f32
    %66 = vector.broadcast %cst_41 : f32 to vector<4x2x1xf32>
    %67 = arith.mulf %65, %66 : vector<4x2x1xf32>
    %68 = vector.broadcast %67 : vector<4x2x1xf32> to vector<4x2x32xf32>
    %69 = arith.subf %63, %68 : vector<4x2x32xf32>
    %70 = arith.mulf %69, %69 : vector<4x2x32xf32>
    %cst_42 = arith.constant dense<0.000000e+00> : vector<4x2xf32>
    %71 = vector.multi_reduction <add>, %70, %cst_42 [2] : vector<4x2x32xf32> to vector<4x2xf32>
    %72 = vector.shape_cast %71 : vector<4x2xf32> to vector<4x2x1xf32>
    %cst_43 = arith.constant 3.125000e-02 : f32
    %73 = vector.broadcast %cst_43 : f32 to vector<4x2x1xf32>
    %74 = arith.mulf %72, %73 : vector<4x2x1xf32>
    %cst_44 = arith.constant 9.99999974E-6 : f32
    %75 = vector.broadcast %cst_44 : f32 to vector<4x2x1xf32>
    %76 = arith.addf %74, %75 : vector<4x2x1xf32>
    %77 = math.rsqrt %76 : vector<4x2x1xf32>
    %78 = vector.broadcast %77 : vector<4x2x1xf32> to vector<4x2x32xf32>
    %79 = arith.mulf %69, %78 : vector<4x2x32xf32>
    %c0_45 = arith.constant 0 : index
    %c0_46 = arith.constant 0 : index
    %c96_47 = arith.constant 96 : index
    %80 = vector.load %arg3[%c0_45, %c0_46, %c96_47] : memref<4x1x128xf32, #tpu.memory_space<vmem>>, vector<4x1x32xf32>
    %81 = vector.broadcast %80 : vector<4x1x32xf32> to vector<4x2x32xf32>
    %82 = arith.mulf %79, %81 : vector<4x2x32xf32>
    %c0_48 = arith.constant 0 : index
    %c0_49 = arith.constant 0 : index
    %c96_50 = arith.constant 96 : index
    %83 = vector.load %arg4[%c0_48, %c0_49, %c96_50] : memref<4x2x128xf32, #tpu.memory_space<vmem>>, vector<4x2x32xf32>
    tpu.vector_store %arg4[%c0_48, %c0_49, %c96_50], %82 {strides = array<i32>} : memref<4x2x128xf32, #tpu.memory_space<vmem>>, vector<4x2x32xf32>,
    return
  }
  func.func @transform_0(%arg0: i32, %arg1: i32) -> (i32, i32, i32) {
    %c0_i32 = arith.constant 0 : i32
    %c0_i32_0 = arith.constant 0 : i32
    return %arg0, %arg1, %c0_i32 : i32, i32, i32
  }
  func.func @transform_1(%arg0: i32, %arg1: i32) -> (i32, i32, i32) {
    %c0_i32 = arith.constant 0 : i32
    %c0_i32_0 = arith.constant 0 : i32
    %c0_i32_1 = arith.constant 0 : i32
    return %arg0, %c0_i32, %c0_i32_0 : i32, i32, i32
  }
  func.func @transform_2(%arg0: i32, %arg1: i32) -> (i32, i32, i32) {
    %c0_i32 = arith.constant 0 : i32
    %c0_i32_0 = arith.constant 0 : i32
    return %arg0, %arg1, %c0_i32 : i32, i32, i32
  }
}

</mosaic_0001>

<bundles_post_ra>
// kernel: tpu_custom_call.1
= control target key start
LH: loop header
LB: loop body
LE: loop exit
PB: predicated region body
PF: predicated region fallthrough
CT: control target
= control target key end

     0   :  { %7 = vsyncpa [#allocation3], 0  ;;  %s1633_s0 = inlined_call_operand.hbm [shape: f32[8,2,128], index: 0, kind: input, shape index: {}]   ;;  %s1634_s1 = inlined_call_operand.hbm [shape: f32[8,1,128], index: 1, kind: input, shape index: {}]   ;;  %s1635_s2 = inlined_call_operand.hbm [shape: f32[8,2,128], index: 2, kind: output, shape index: {}]  }
   0x1   :  { %9 = vsyncpa [#allocation3 + $0x1], 0 }
   0x2   :  { %10 = vsyncpa [#allocation6], 0 }
   0x3   :  { %12 = vsyncpa [#allocation6 + $0x1], 0 }
   0x4   :  { %13 = vsyncpa [#allocation4], 0 }
   0x5   :  { %15 = vsyncpa [#allocation4 + $0x1], 0  ;;  %s1132_s9 = smov 0   ;;  %s1134_s10 = smov 0  }
   0x6   :  { %s1136_s11 = smov 0   ;;  %s1138_s12 = smov 0  }
   0x7   :  { %s1140_s13 = smov 0   ;;  %s1142_s14 = smov 0  }
   0x8 LB: > { %s813_s15 = sadd.s32 4294967295, %s1104_s14   ;;  %s814_s16 = sadd.s32 4294967294, %s1104_s14   ;;  %s1104_s14 = sphi %s1142_s14, %s21_s14   ;;  %s1100_s13 = sphi %s1140_s13, %s1653_s13   ;;  %s1096_s12 = sphi %s1138_s12, %s1652_s12   ;;  %s1092_s11 = sphi %s1136_s11, %s1651_s11   ;;  %s1088_s10 = sphi %s1134_s10, %s1650_s10   ;;  %s1084_s9 = sphi %s1132_s9, %s1649_s9  }
   0x9   : > { %s33_s17 = sadd.s32 1, %s1100_s13  ;;  %s42_s18 = sadd.s32 1, %s1092_s11 }
   0xa   : > { %p35_p0 = scmp.ge.s32.totalorder %s33_s17, 2  ;;  %p49_p1 = scmp.ne.s32.totalorder %s1092_s11, %s1088_s10 }
   0xb   : > { %p50_p2 = scmp.eq.s32.totalorder %s1104_s14, 0  ;;  %p55_p3 = scmp.ne.s32.totalorder %s1088_s10, %s1084_s9 }
   0xc   : > { %s1655_s17 = smov (%p35_p0, %s33_s17), 0  ;;  %p56_p5 = scmp.eq.s32.totalorder %s813_s15, 0 }
   0xd   : > { %p1173_p4 = por %p50_p2, %p49_p1  ;;  %s37_s20 = ssub.s32 %s1100_s13, %s1655_s17 }
   0xe   : > { %p107_p6 = scmp.eq.s32.totalorder %s813_s15, 1  ;;  %p40_p7 = scmp.eq.s32.totalorder %s37_s20, 0 }
   0xf   : > { %p1179_p8 = por %p56_p5, %p55_p3  ;;  %p113_p10 = scmp.eq.s32.totalorder %s814_s16, 1 }
  0x10   : > { %p1183_p9 = por %p107_p6, %p49_p1  ;;  %p868_p13 = scmp.lt.s32.totalorder %s1104_s14, 2 }
  0x11   : > { %s1639_s21 = scalar_select %p1179_p8, 1, 0 }
  0x12   : > { %s1640_s22 = scalar_select %p1183_p9, 1, 0 }
  0x13   : > { %s1188_s23 = scalar_select %p40_p7, %s1092_s11, %s42_s18  }
  0x14   : > { %p1190_p11 = por %p113_p10, %p55_p3  ;;  %s1197_s25 = sand.u32 1, %s1092_s11  }
  0x15   : > { %s817_s26 = sshll.u32 %s1197_s25, 3  ;;  %s848_s27 = sshll.u32 %s1100_s13, 7 }
  0x16   : > { %s1641_s24 = scalar_select %p1190_p11, 1, 0 }
  0x17   : > { %s1204_s30 = scalar_lea.hbm %s1633_s0, %s848_s27  ;;  %s137_s3 = scalar_lea.vmem [#allocation2], %s817_s26 }
  0x18   : > { %s145_s4 = sshll.u32 %s137_s3, 4  ;;  %p1210_p0 = pnand %p868_p13, %p1173_p4  ;;  %s1206_s4 = int_to_ptr.vmem [resolvable:$true] %s145_s4 }
  0x19   : > { %s134_s6 = scalar_lea.sflag [#allocation3], %s1197_s25  ;;  %s958_s7 = scalar_lea.hbm %s1204_s30, 128 }
  0x1a   : > { %p959_p2 = scmp.ne.s32.totalorder %s1204_s30, %s958_s7  ;;  %p960_p3 = pneg %p1210_p0 }
  0x1b   : > { %s963_s16 = scalar_lea.hbm %s1633_s0, 256  ;;  %p964_p4 = scmp.lt.u32.totalorder %s1204_s30, %s1633_s0 }
  0x1c   : > { %p961_p5 = pnand %p960_p3, %p959_p2  ;;  %p965_p7 = scmp.lt.u32.totalorder %s963_s16, %s958_s7 }
  0x1d   : > { %p967_p13 = scmp.lt.u32.totalorder %s958_s7, %s1204_s30 }
  0x1e   : > { %p962_p6 = pneg %p961_p5  ;;  %p966_p10 = por %p965_p7, %p964_p4 }
  0x20   : > { %p968_p12 = por %p967_p13, %p966_p10 }
  0x22   : > { %p969_p1 = pnand %p968_p12, %p962_p6 }
  0x24   : > { %972 = shalt.err (!%p969_p1)
}
  0x25   : > { %s973_s20 = scalar_lea.vmem %s1206_s4, 128  ;;  %s1106_s26 = smov [#allocation2]  }
  0x26   : > { %p974_p2 = scmp.ne.s32.totalorder %s1206_s4, %s973_s20  ;;  %s978_s27 = sshll.u32 %s1106_s26, 4  ;;  %s979_s27 = int_to_ptr.vmem [resolvable:$false] %s978_s27 }
  0x27   : > { %s980_s28 = scalar_lea.vmem %s979_s27, 256  ;;  %p981_p9 = scmp.lt.s32.totalorder %s1206_s4, %s979_s27 }
  0x28   : > { %p976_p5 = pnand %p974_p2, %p960_p3  ;;  %p982_p4 = scmp.lt.s32.totalorder %s980_s28, %s973_s20 }
  0x2a   : > { %p977_p11 = pneg %p976_p5  ;;  %p983_p7 = por %p982_p4, %p981_p9 }
  0x2c   : > { %p984_p10 = pnand %p983_p7, %p977_p11 }
  0x2e   : > { %987 = shalt.err (!%p984_p10)
}
  0x2f   : > { %s1107_s29 = smov 32   ;;  %s1108_s3 = smov 2  }
  0x30   : > { %860 = dma.hbm_to_vmem [thread:$0]  (!%p1210_p0), %s1204_s30, 128, %s1206_s4, %s134_s6, %s1107_s29, %s1107_s29, %s1108_s3  }
  0x31   : > { %p174_p12 = scmp.lt.s32.totalorder %s1104_s14, 3  ;;  %s820_s7 = sshll.u32 %s1197_s25, 2 }
  0x32   : > { %s849_s8 = sshll.u32 %s1100_s13, 6  ;;  %p1643_p9 = scmp.ge.s32.totalorder %s1104_s14, 1 }
  0x33   : > { %s1255_s19 = scalar_lea.hbm %s1634_s1, %s849_s8  ;;  %s159_s20 = scalar_lea.vmem [#allocation5], %s820_s7 }
  0x34   : > { %p1248_p11 = pnand %p1643_p9, %p174_p12  ;;  %s166_s26 = sshll.u32 %s159_s20, 4  ;;  %s1257_s26 = int_to_ptr.vmem [resolvable:$true] %s166_s26 }
  0x35   : > { %s156_s30 = scalar_lea.sflag [#allocation6], %s1197_s25  ;;  %s988_s4 = scalar_lea.hbm %s1255_s19, 64 }
  0x36   : > { %p989_p1 = scmp.ne.s32.totalorder %s1255_s19, %s988_s4  ;;  %s993_s28 = scalar_lea.hbm %s1634_s1, 128 }
  0x37   : > { %p994_p2 = scmp.lt.u32.totalorder %s1255_s19, %s1634_s1  ;;  %p995_p5 = scmp.lt.u32.totalorder %s993_s28, %s988_s4 }
  0x38   : > { %p991_p6 = pnand %p989_p1, %p960_p3  ;;  %p997_p7 = scmp.lt.u32.totalorder %s988_s4, %s1255_s19 }
  0x39   : > { %p996_p4 = por %p995_p5, %p994_p2 }
  0x3a   : > { %p992_p13 = pneg %p991_p6 }
  0x3b   : > { %p998_p10 = por %p997_p7, %p996_p4 }
  0x3d   : > { %p999_p12 = pnand %p998_p10, %p992_p13 }
  0x3f   : > { %1002 = shalt.err (!%p999_p12)
}
  0x40   : > { %s1003_s7 = scalar_lea.vmem %s1257_s26, 64  ;;  %s1109_s8 = smov [#allocation5]  }
  0x41   : > { %p1004_p9 = scmp.ne.s32.totalorder %s1257_s26, %s1003_s7  ;;  %s1008_s16 = sshll.u32 %s1109_s8, 4  ;;  %s1009_s16 = int_to_ptr.vmem [resolvable:$false] %s1008_s16 }
  0x42   : > { %s1010_s18 = scalar_lea.vmem %s1009_s16, 128  ;;  %p1011_p8 = scmp.lt.s32.totalorder %s1257_s26, %s1009_s16 }
  0x43   : > { %p1006_p1 = pnand %p1004_p9, %p960_p3  ;;  %p1012_p2 = scmp.lt.s32.totalorder %s1010_s18, %s1003_s7 }
  0x45   : > { %p1007_p6 = pneg %p1006_p1  ;;  %p1013_p5 = por %p1012_p2, %p1011_p8 }
  0x47   : > { %p1014_p4 = pnand %p1013_p5, %p1007_p6 }
  0x49   : > { %1017 = shalt.err (!%p1014_p4)
}
  0x4a   : > { %s1110_s20 = smov 16   ;;  %s1111_s4 = smov 1  }
  0x4b   : > { %863 = dma.hbm_to_vmem [thread:$0]  (!%p1210_p0), %s1255_s19, 64, %s1257_s26, %s156_s30, %s1110_s20, %s1110_s20, %s1111_s4  }
  0x4c   : > { %178 = sbr.rel (%p1248_p11) target bundleno = 744 (0x2e8), region = 28  ;;  %s1288_s6 = sand.u32 (!%p1248_p11), 1, %s1088_s10  }
  0x4d   : > { %s824_s27 = sshll.u32 (!%p1248_p11), %s1288_s6, 3  ;;  %s181_s28 = scalar_lea.sflag (!%p1248_p11), [#allocation3], %s1288_s6 }
  0x4e   : > { %s1294_s29 = scalar_lea.vmem (!%p1248_p11), [#allocation2], %s824_s27  ;;  %p1645_p8 = scmp.ne.s32.totalorder (!%p1248_p11), %s1639_s21, 0 }
  0x53   : > { %1071 = dma.done.wait (%p1645_p8), %s181_s28, 128  }
  0x54   : > { %1073 = vsyncadd (%p1645_p8), %s181_s28, 4294967168  ;;  %s825_s25 = sshll.u32 %s1288_s6, 2  ;;  %s190_s5 = scalar_lea.sflag [#allocation6], %s1288_s6 }
  0x55   : > { %s1302_s15 = scalar_lea.vmem [#allocation5], %s825_s25 }
  0x56   : > { %1075 = dma.done.wait (%p1645_p8), %s190_s5, 64  }
  0x57   : > { %1077 = vsyncadd (%p1645_p8), %s190_s5, 4294967232  ;;  %v1309_v0 = vld [vmem:[%s1294_s29] sm:$0x3]  ;;  %v1312_v1 = vld [vmem:[%s1294_s29 + $0x4] sm:$0x3]  ;;  %s1112_s19 = smov 96  }
  0x58   : > { %323 = vrot.lane.b32.xlu0 %v1309_v0, %s1112_s19  ;;  %327 = vrot.lane.b32.xlu1 %v1312_v1, %s1112_s19  ;;  %v1319_v2 = vld [vmem:[%s1294_s29 + $0x2] sm:$0x3]  ;;  %v1322_v3 = vld [vmem:[%s1294_s29 + $0x6] sm:$0x3]  ;;  %s1113_s21 = smov 64   ;;  %s1114_s26 = smov 32  }
  0x59   : > { %v1329_v4 = vld [vmem:[%s1294_s29] sm:$0x3]  ;;  %v1332_v5 = vld [vmem:[%s1294_s29 + $0x2] sm:$0x3]  ;;  %v1339_v6 = vld [vmem:[%s1294_s29 + $0x4] sm:$0x3] }
  0x5a   : > { %v1342_v7 = vld [vmem:[%s1294_s29 + $0x6] sm:$0x3]  ;;  %v1349_v8 = vld [vmem:[%s1294_s29] sm:$0x3]  ;;  %v1352_v9 = vld [vmem:[%s1294_s29 + $0x2] sm:$0x3] }
  0x5b   : > { %v1359_v10 = vld [vmem:[%s1294_s29 + $0x4] sm:$0x3]  ;;  %v1362_v11 = vld [vmem:[%s1294_s29 + $0x6] sm:$0x3]  ;;  %vm226_vm0 = vcmask 254976   ;;  %s1497_s30 = scalar_lea.vmem [#allocation7], %s824_s27 }
  0x5c   : > { %325 = vrot.lane.b32.xlu0 %v1319_v2, %s1112_s19  ;;  %329 = vrot.lane.b32.xlu1 %v1322_v3, %s1112_s19  ;;  %v222_v34 = vld [vmem:[%s1294_s29] sm:$0x3]  ;;  %v223_v38 = vld [vmem:[%s1294_s29 + $0x2] sm:$0x3]  ;;  %vm435_vm1 = vcmask 517376   ;;  %vm560_vm2 = vcmask 779776  }
  0x5d   : > { %v227_v37 = vsel %vm226_vm0, %v222_v34, 0.0  ;;  %v224_v39 = vld [vmem:[%s1294_s29 + $0x4] sm:$0x3]  ;;  %v230_v40 = vsel %vm226_vm0, %v223_v38, 0.0  ;;  %v225_v42 = vld [vmem:[%s1294_s29 + $0x6] sm:$0x3] }
  0x5e   : > { %v233_v41 = vsel %vm226_vm0, %v224_v39, 0.0  ;;  %v236_v43 = vsel %vm226_vm0, %v225_v42, 0.0  ;;  %vm685_vm3 = vcmask 1042176   ;;  %s850_s3 = sshll.u32 %s1096_s12, 7  ;;  %s705_s7 = sshll.u32 %s1497_s30, 4  ;;  %s1580_s7 = int_to_ptr.vmem [resolvable:$true] %s705_s7 }
  0x5f   : > { %s1577_s18 = scalar_lea.hbm %s1635_s2, %s850_s3  ;;  %s691_s12 = scalar_lea.sflag [#allocation4], %s1288_s6 }
  0x60   : > { %448 = vrot.lane.b32.xlu0 %v1329_v4, %s1113_s21  ;;  %450 = vrot.lane.b32.xlu1 %v1332_v5, %s1113_s21  ;;  %s1018_s20 = scalar_lea.vmem %s1580_s7, 128  ;;  %p1646_p3 = scmp.ne.s32.totalorder %s1640_s22, 0 }
  0x61   : > { %p1019_p0 = scmp.ne.s32.totalorder %s1580_s7, %s1018_s20  ;;  %s1115_s4 = smov [#allocation7]  }
  0x62   : > { %s1022_s27 = sshll.u32 %s1115_s4, 4  ;;  %s1023_s27 = int_to_ptr.vmem [resolvable:$false] %s1022_s27 }
  0x63   : > { %p1020_p11 = pnand %p1019_p0, %p1646_p3  ;;  %s1024_s28 = scalar_lea.vmem %s1023_s27, 256 }
  0x64   : > { %452 = vrot.lane.b32.xlu0 %v1339_v6, %s1113_s21  ;;  %454 = vrot.lane.b32.xlu1 %v1342_v7, %s1113_s21  ;;  %p1025_p7 = scmp.lt.s32.totalorder %s1580_s7, %s1023_s27  ;;  %p1026_p10 = scmp.lt.s32.totalorder %s1024_s28, %s1018_s20 }
  0x65   : > { %p1021_p13 = pneg %p1020_p11 }
  0x66   : > { %p1027_p12 = por %p1026_p10, %p1025_p7 }
  0x68   : > { %573 = vrot.lane.b32.xlu0 %v1349_v8, %s1114_s26  ;;  %575 = vrot.lane.b32.xlu1 %v1352_v9, %s1114_s26  ;;  %p1028_p9 = pnand %p1027_p12, %p1021_p13 }
  0x6c   : > { %577 = vrot.lane.b32.xlu0 %v1359_v10, %s1114_s26  ;;  %579 = vrot.lane.b32.xlu1 %v1362_v11, %s1114_s26 }
  0xca   : > { %v324_v12 = vpop.permute.xlu0 %323  ;;  %v328_v13 = vpop.permute.xlu1 %327 }
  0xcb   : > { %v335_v14 = vsel %vm226_vm0, %v324_v12, 0.0  ;;  %v341_v15 = vsel %vm226_vm0, %v328_v13, 0.0 }
  0xcc   : > { %336 = vadd.xlane.f32.xlu0 %v335_v14 }
  0xce   : > { %v326_v16 = vpop.permute.xlu0 %325  ;;  %v330_v17 = vpop.permute.xlu1 %329 }
  0xcf   : > { %v338_v18 = vsel %vm226_vm0, %v326_v16, 0.0  ;;  %v344_v19 = vsel %vm226_vm0, %v330_v17, 0.0 }
  0xd0   : > { %342 = vadd.xlane.f32.xlu0 %v341_v15  ;;  %339 = vadd.xlane.f32.xlu1 %v338_v18 }
  0xd2   : > { %v449_v20 = vpop.permute.xlu0 %448  ;;  %v451_v21 = vpop.permute.xlu1 %450 }
  0xd3   : > { %v460_v22 = vsel %vm226_vm0, %v449_v20, 0.0  ;;  %v463_v23 = vsel %vm226_vm0, %v451_v21, 0.0 }
  0xd4   : > { %345 = vadd.xlane.f32.xlu0 %v344_v19  ;;  %461 = vadd.xlane.f32.xlu1 %v460_v22 }
  0xd6   : > { %v453_v24 = vpop.permute.xlu0 %452  ;;  %v455_v25 = vpop.permute.xlu1 %454 }
  0xd7   : > { %v466_v26 = vsel %vm226_vm0, %v453_v24, 0.0  ;;  %v469_v27 = vsel %vm226_vm0, %v455_v25, 0.0 }
  0xd8   : > { %464 = vadd.xlane.f32.xlu0 %v463_v23  ;;  %467 = vadd.xlane.f32.xlu1 %v466_v26 }
  0xda   : > { %v574_v28 = vpop.permute.xlu0 %573  ;;  %v576_v29 = vpop.permute.xlu1 %575 }
  0xdb   : > { %v585_v30 = vsel %vm226_vm0, %v574_v28, 0.0  ;;  %v588_v31 = vsel %vm226_vm0, %v576_v29, 0.0 }
  0xdc   : > { %470 = vadd.xlane.f32.xlu0 %v469_v27  ;;  %586 = vadd.xlane.f32.xlu1 %v585_v30 }
  0xde   : > { %v578_v32 = vpop.permute.xlu0 %577  ;;  %v580_v33 = vpop.permute.xlu1 %579 }
  0xdf   : > { %v591_v35 = vsel %vm226_vm0, %v578_v32, 0.0  ;;  %v594_v36 = vsel %vm226_vm0, %v580_v33, 0.0 }
  0xe0   : > { %589 = vadd.xlane.f32.xlu0 %v588_v31  ;;  %592 = vadd.xlane.f32.xlu1 %v591_v35 }
  0xe4   : > { %595 = vadd.xlane.f32.xlu0 %v594_v36  ;;  %228 = vadd.xlane.f32.xlu1 %v227_v37 }
  0xe8   : > { %231 = vadd.xlane.f32.xlu0 %v230_v40  ;;  %234 = vadd.xlane.f32.xlu1 %v233_v41 }
  0xec   : > { %237 = vadd.xlane.f32.xlu0 %v236_v43 }
 0x159   : > { %v337_v44 = vpop.xlane.xlu0 %336 }
 0x15a   : > { %v347_v24 = vmul.f32 0.03125, %v337_v44 }
 0x15c   : > { %v1411_v25 = vsub.f32 %v1309_v0, %v347_v24 }
 0x15d   : > { %v340_v45 = vpop.xlane.xlu1 %339  ;;  %v343_v46 = vpop.xlane.xlu0 %342 }
 0x15e   : > { %v349_v26 = vmul.f32 0.03125, %v343_v46  ;;  %v355_v29 = vmul.f32 %v1411_v25, %v1411_v25  ;;  %v348_v30 = vmul.f32 0.03125, %v340_v45 }
 0x160   : > { %v1414_v27 = vsub.f32 %v1312_v1, %v349_v26  ;;  %v1425_v0 = vsub.f32 %v1319_v2, %v348_v30  ;;  %v1493_v26 = vld [vmem:[%s1302_s15 + $0x1] ss:$0 sm:$0xff] }
 0x161   : > { %v462_v47 = vpop.xlane.xlu1 %461  ;;  %v346_v48 = vpop.xlane.xlu0 %345 }
 0x162   : > { %v350_v28 = vmul.f32 0.03125, %v346_v48  ;;  %v472_v31 = vmul.f32 0.03125, %v462_v47  ;;  %v357_v33 = vmul.f32 %v1414_v27, %v1414_v27  ;;  %v356_v36 = vmul.f32 %v1425_v0, %v1425_v0 }
 0x164   : > { %v1420_v32 = vsub.f32 %v1322_v3, %v350_v28  ;;  %v1429_v1 = vsub.f32 %v1329_v4, %v472_v31 }
 0x165   : > { %v468_v49 = vpop.xlane.xlu1 %467  ;;  %v465_v50 = vpop.xlane.xlu0 %464 }
 0x166   : > { %v358_v35 = vmul.f32 %v1420_v32, %v1420_v32  ;;  %v474_v3 = vmul.f32 0.03125, %v468_v49  ;;  %v480_v37 = vmul.f32 %v1429_v1, %v1429_v1 }
 0x168   : > { %v1444_v4 = vsub.f32 %v1339_v6, %v474_v3  ;;  %v1510_v3 = vld [vmem:[%s1302_s15 + $0x3] ss:$0 sm:$0xff] }
 0x169   : > { %v587_v51 = vpop.xlane.xlu1 %586  ;;  %v471_v52 = vpop.xlane.xlu0 %470 }
 0x16a   : > { %v597_v40 = vmul.f32 0.03125, %v587_v51 }
 0x16d   : > { %v593_v53 = vpop.xlane.xlu1 %592  ;;  %v590_v54 = vpop.xlane.xlu0 %589 }
 0x16e   : > { %v598_v6 = vmul.f32 0.03125, %v590_v54  ;;  %v599_v44 = vmul.f32 0.03125, %v593_v53 }
 0x170   : > { %v1462_v45 = vsub.f32 %v1352_v9, %v598_v6  ;;  %v1468_v46 = vsub.f32 %v1359_v10, %v599_v44 }
 0x171   : > { %v1388_v55 = vpop.xlane.xlu0 %595  ;;  %v229_v56 = vpop.xlane.xlu1 %228 }
 0x172   : > { %v239_v57 = vmul.f32 0.03125, %v229_v56  ;;  %v606_v47 = vmul.f32 %v1462_v45, %v1462_v45  ;;  %v607_v9 = vmul.f32 %v1468_v46, %v1468_v46 }
 0x174   : > { %v1390_v58 = vsub.f32 %v222_v34, %v239_v57  ;;  %v473_v34 = vmul.f32 0.03125, %v465_v50 }
 0x175   : > { %v232_v59 = vpop.xlane.xlu0 %231  ;;  %v235_v60 = vpop.xlane.xlu1 %234 }
 0x176   : > { %v240_v61 = vmul.f32 0.03125, %v232_v59  ;;  %v241_v62 = vmul.f32 0.03125, %v235_v60  ;;  %v247_v63 = vmul.f32 %v1390_v58, %v1390_v58  ;;  %v1438_v2 = vsub.f32 %v1332_v5, %v473_v34 }
 0x177   : > { %v482_v5 = vmul.f32 %v1444_v4, %v1444_v4 }
 0x178   : > { %v1394_v12 = vsub.f32 %v223_v38, %v240_v61  ;;  %v1396_v13 = vsub.f32 %v224_v39, %v241_v62  ;;  %v251_v14 = vsel %vm226_vm0, %v247_v63, 0.0  ;;  %v475_v38 = vmul.f32 0.03125, %v471_v52 }
 0x179   : > { %v238_v15 = vpop.xlane.xlu0 %237  ;;  %252 = vadd.xlane.f32.xlu1 %v251_v14  ;;  %v481_v39 = vmul.f32 %v1438_v2, %v1438_v2 }
 0x17a   : > { %v242_v16 = vmul.f32 0.03125, %v238_v15  ;;  %v248_v17 = vmul.f32 %v1394_v12, %v1394_v12  ;;  %v249_v18 = vmul.f32 %v1396_v13, %v1396_v13  ;;  %v1450_v41 = vsub.f32 %v1342_v7, %v475_v38 }
 0x17c   : > { %v1403_v19 = vsub.f32 %v225_v42, %v242_v16  ;;  %v254_v20 = vsel %vm226_vm0, %v248_v17, 0.0  ;;  %v257_v21 = vsel %vm226_vm0, %v249_v18, 0.0  ;;  %v1456_v42 = vsub.f32 %v1349_v8, %v597_v40  ;;  %v1487_v18 = vld [vmem:[%s1302_s15] ss:$0 sm:$0xff] }
 0x17d   : > { %255 = vadd.xlane.f32.xlu0 %v254_v20  ;;  %258 = vadd.xlane.f32.xlu1 %v257_v21  ;;  %v483_v43 = vmul.f32 %v1450_v41, %v1450_v41  ;;  %v600_v8 = vmul.f32 0.03125, %v1388_v55 }
 0x17e   : > { %v250_v22 = vmul.f32 %v1403_v19, %v1403_v19  ;;  %v605_v7 = vmul.f32 %v1456_v42, %v1456_v42 }
 0x17f   : > { %v1475_v48 = vsub.f32 %v1362_v11, %v600_v8 }
 0x180   : > { %v260_v23 = vsel %vm226_vm0, %v250_v22, 0.0 }
 0x181   : > { %261 = vadd.xlane.f32.xlu0 %v260_v23  ;;  %v608_v49 = vmul.f32 %v1475_v48, %v1475_v48 }
 0x18e   : > { %363 = vrot.lane.b32.xlu1 %v355_v29, %s1112_s19  ;;  %v1503_v29 = vld [vmem:[%s1302_s15 + $0x2] ss:$0 sm:$0xff] }
 0x192   : > { %367 = vrot.lane.b32.xlu1 %v357_v33, %s1112_s19 }
 0x196   : > { %369 = vrot.lane.b32.xlu1 %v358_v35, %s1112_s19 }
 0x197   : > { %365 = vrot.lane.b32.xlu0 %v356_v36, %s1112_s19 }
 0x19a   : > { %488 = vrot.lane.b32.xlu1 %v480_v37, %s1113_s21 }
 0x19e   : > { %490 = vrot.lane.b32.xlu1 %v481_v39, %s1113_s21 }
 0x1a2   : > { %492 = vrot.lane.b32.xlu1 %v482_v5, %s1113_s21 }
 0x1a6   : > { %494 = vrot.lane.b32.xlu1 %v483_v43, %s1113_s21 }
 0x1aa   : > { %613 = vrot.lane.b32.xlu1 %v605_v7, %s1114_s26 }
 0x1ae   : > { %615 = vrot.lane.b32.xlu1 %v606_v47, %s1114_s26 }
 0x1b2   : > { %617 = vrot.lane.b32.xlu1 %v607_v9, %s1114_s26 }
 0x1b6   : > { %619 = vrot.lane.b32.xlu1 %v608_v49, %s1114_s26 }
 0x206   : > { %v253_v10 = vpop.xlane.xlu1 %252 }
 0x207   : > { %v263_v50 = vmul.f32 0.03125, %v253_v10 }
 0x209   : > { %v267_v51 = vadd.f32 1e-05, %v263_v50 }
 0x20a   : > { %v256_v52 = vpop.xlane.xlu0 %255  ;;  %v259_v53 = vpop.xlane.xlu1 %258 }
 0x20b   : > { %926 = vrsqrt.f32 %v267_v51  ;;  %v264_v54 = vmul.f32 0.03125, %v256_v52  ;;  %v265_v55 = vmul.f32 0.03125, %v259_v53 }
 0x20d   : > { %v268_v11 = vadd.f32 1e-05, %v264_v54  ;;  %v269_v56 = vadd.f32 1e-05, %v265_v55 }
 0x20e   : > { %v262_v57 = vpop.xlane.xlu0 %261  ;;  %v364_v59 = vpop.permute.xlu1 %363 }
 0x20f   : > { %928 = vrsqrt.f32 %v268_v11  ;;  %v266_v60 = vmul.f32 0.03125, %v262_v57  ;;  %v375_v61 = vsel %vm226_vm0, %v364_v59, 0.0 }
 0x210   : > { %930 = vrsqrt.f32 %v269_v56  ;;  %376 = vadd.xlane.f32.xlu0 %v375_v61 }
 0x211   : > { %v270_v62 = vadd.f32 1e-05, %v266_v60 }
 0x212   : > { %v366_v63 = vpop.permute.xlu0 %365  ;;  %v368_v14 = vpop.permute.xlu1 %367 }
 0x213   : > { %932 = vrsqrt.f32 %v270_v62  ;;  %v378_v15 = vsel %vm226_vm0, %v366_v63, 0.0  ;;  %v381_v16 = vsel %vm226_vm0, %v368_v14, 0.0 }
 0x214   : > { %379 = vadd.xlane.f32.xlu0 %v378_v15  ;;  %382 = vadd.xlane.f32.xlu1 %v381_v16 }
 0x215   : > { %v927_v17 = vpop.eup %926 }
 0x216   : > { %v275_v20 = vmul.f32 %v927_v17, %v1390_v58  ;;  %v370_v21 = vpop.permute.xlu1 %369 }
 0x217   : > { %v384_v22 = vsel %vm226_vm0, %v370_v21, 0.0 }
 0x218   : > { %v307_v23 = vmul.f32 %v1487_v18, %v275_v20  ;;  %385 = vadd.xlane.f32.xlu0 %v384_v22 }
 0x219   : > { %v929_v24 = vpop.eup %928 }
 0x21a   : > { %v931_v28 = vpop.eup %930  ;;  %311 = vst.msk [vmem:[%s1497_s30] sm:$0x3] %vm226_vm0, %v307_v23  ;;  %v276_v58 = vmul.f32 %v929_v24, %v1394_v12  ;;  %v489_v30 = vpop.permute.xlu1 %488 }
 0x21b   : > { %v277_v31 = vmul.f32 %v931_v28, %v1396_v13  ;;  %v500_v33 = vsel %vm226_vm0, %v489_v30, 0.0 }
 0x21c   : > { %v308_v34 = vmul.f32 %v1493_v26, %v276_v58  ;;  %501 = vadd.xlane.f32.xlu0 %v500_v33 }
 0x21d   : > { %v933_v35 = vpop.eup %932  ;;  %v309_v36 = vmul.f32 %v1503_v29, %v277_v31 }
 0x21e   : > { %312 = vst.msk [vmem:[%s1497_s30 + $0x2] sm:$0x3] %vm226_vm0, %v308_v34  ;;  %v278_v12 = vmul.f32 %v933_v35, %v1403_v19  ;;  %v491_v37 = vpop.permute.xlu1 %490 }
 0x21f   : > { %313 = vst.msk [vmem:[%s1497_s30 + $0x4] sm:$0x3] %vm226_vm0, %v309_v36  ;;  %v503_v38 = vsel %vm226_vm0, %v491_v37, 0.0 }
 0x220   : > { %v310_v13 = vmul.f32 %v1510_v3, %v278_v12  ;;  %504 = vadd.xlane.f32.xlu0 %v503_v38 }
 0x222   : > { %314 = vst.msk [vmem:[%s1497_s30 + $0x6] sm:$0x3] %vm226_vm0, %v310_v13  ;;  %v493_v39 = vpop.permute.xlu1 %492 }
 0x223   : > { %v506_v40 = vsel %vm226_vm0, %v493_v39, 0.0 }
 0x224   : > { %507 = vadd.xlane.f32.xlu0 %v506_v40 }
 0x226   : > { %v495_v5 = vpop.permute.xlu1 %494 }
 0x227   : > { %v509_v6 = vsel %vm226_vm0, %v495_v5, 0.0 }
 0x228   : > { %510 = vadd.xlane.f32.xlu0 %v509_v6 }
 0x22a   : > { %v614_v43 = vpop.permute.xlu1 %613 }
 0x22b   : > { %v625_v19 = vsel %vm226_vm0, %v614_v43, 0.0 }
 0x22c   : > { %626 = vadd.xlane.f32.xlu0 %v625_v19 }
 0x22e   : > { %v616_v44 = vpop.permute.xlu1 %615 }
 0x22f   : > { %v628_v7 = vsel %vm226_vm0, %v616_v44, 0.0 }
 0x230   : > { %629 = vadd.xlane.f32.xlu0 %v628_v7 }
 0x232   : > { %v618_v8 = vpop.permute.xlu1 %617 }
 0x233   : > { %v631_v47 = vsel %vm226_vm0, %v618_v8, 0.0 }
 0x234   : > { %632 = vadd.xlane.f32.xlu0 %v631_v47 }
 0x236   : > { %v620_v9 = vpop.permute.xlu1 %619 }
 0x237   : > { %v634_v49 = vsel %vm226_vm0, %v620_v9, 0.0 }
 0x238   : > { %635 = vadd.xlane.f32.xlu0 %v634_v49 }
 0x29d   : > { %v377_v10 = vpop.xlane.xlu0 %376 }
 0x29e   : > { %v387_v50 = vmul.f32 0.03125, %v377_v10 }
 0x2a0   : > { %v391_v51 = vadd.f32 1e-05, %v387_v50 }
 0x2a1   : > { %v380_v52 = vpop.xlane.xlu0 %379  ;;  %v383_v53 = vpop.xlane.xlu1 %382 }
 0x2a2   : > { %934 = vrsqrt.f32 %v391_v51  ;;  %v388_v54 = vmul.f32 0.03125, %v380_v52  ;;  %v389_v55 = vmul.f32 0.03125, %v383_v53 }
 0x2a4   : > { %v392_v11 = vadd.f32 1e-05, %v388_v54  ;;  %v393_v56 = vadd.f32 1e-05, %v389_v55 }
 0x2a5   : > { %v386_v57 = vpop.xlane.xlu0 %385 }
 0x2a6   : > { %936 = vrsqrt.f32 %v392_v11  ;;  %v390_v59 = vmul.f32 0.03125, %v386_v57 }
 0x2a7   : > { %938 = vrsqrt.f32 %v393_v56 }
 0x2a8   : > { %v394_v60 = vadd.f32 1e-05, %v390_v59 }
 0x2a9   : > { %v502_v61 = vpop.xlane.xlu0 %501 }
 0x2aa   : > { %940 = vrsqrt.f32 %v394_v60  ;;  %v512_v62 = vmul.f32 0.03125, %v502_v61 }
 0x2ac   : > { %v935_v63 = vpop.eup %934  ;;  %v516_v14 = vadd.f32 1e-05, %v512_v62 }
 0x2ad   : > { %v399_v15 = vmul.f32 %v935_v63, %v1411_v25  ;;  %v505_v16 = vpop.xlane.xlu0 %504 }
 0x2ae   : > { %942 = vrsqrt.f32 %v516_v14  ;;  %v513_v17 = vmul.f32 0.03125, %v505_v16 }
 0x2af   : > { %v431_v20 = vmul.f32 %v1487_v18, %v399_v15 }
 0x2b0   : > { %v937_v21 = vpop.eup %936  ;;  %v517_v22 = vadd.f32 1e-05, %v513_v17 }
 0x2b1   : > { %v939_v23 = vpop.eup %938  ;;  %436 = vst.msk [vmem:[%s1497_s30] sm:$0x3] %vm435_vm1, %v431_v20  ;;  %v400_v24 = vmul.f32 %v937_v21, %v1425_v0  ;;  %v508_v28 = vpop.xlane.xlu0 %507 }
 0x2b2   : > { %v401_v58 = vmul.f32 %v939_v23, %v1414_v27  ;;  %944 = vrsqrt.f32 %v517_v22  ;;  %v514_v25 = vmul.f32 0.03125, %v508_v28 }
 0x2b3   : > { %v432_v30 = vmul.f32 %v1493_v26, %v400_v24 }
 0x2b4   : > { %v941_v31 = vpop.eup %940  ;;  %v433_v33 = vmul.f32 %v1503_v29, %v401_v58  ;;  %v518_v34 = vadd.f32 1e-05, %v514_v25 }
 0x2b5   : > { %437 = vst.msk [vmem:[%s1497_s30 + $0x2] sm:$0x3] %vm435_vm1, %v432_v30  ;;  %v402_v35 = vmul.f32 %v941_v31, %v1420_v32  ;;  %v511_v36 = vpop.xlane.xlu0 %510 }
 0x2b6   : > { %438 = vst.msk [vmem:[%s1497_s30 + $0x4] sm:$0x3] %vm435_vm1, %v433_v33  ;;  %946 = vrsqrt.f32 %v518_v34  ;;  %v515_v0 = vmul.f32 0.03125, %v511_v36 }
 0x2b7   : > { %v434_v27 = vmul.f32 %v1510_v3, %v402_v35 }
 0x2b8   : > { %v943_v12 = vpop.eup %942  ;;  %v519_v37 = vadd.f32 1e-05, %v515_v0 }
 0x2b9   : > { %439 = vst.msk [vmem:[%s1497_s30 + $0x6] sm:$0x3] %vm435_vm1, %v434_v27  ;;  %v524_v38 = vmul.f32 %v943_v12, %v1429_v1  ;;  %v627_v13 = vpop.xlane.xlu0 %626 }
 0x2ba   : > { %948 = vrsqrt.f32 %v519_v37  ;;  %v637_v39 = vmul.f32 0.03125, %v627_v13 }
 0x2bb   : > { %v556_v32 = vmul.f32 %v1487_v18, %v524_v38 }
 0x2bc   : > { %v945_v40 = vpop.eup %944  ;;  %v641_v5 = vadd.f32 1e-05, %v637_v39 }
 0x2bd   : > { %561 = vst.msk [vmem:[%s1497_s30] sm:$0x3] %vm560_vm2, %v556_v32  ;;  %v525_v6 = vmul.f32 %v945_v40, %v1438_v2  ;;  %v630_v43 = vpop.xlane.xlu0 %629 }
 0x2be   : > { %950 = vrsqrt.f32 %v641_v5  ;;  %v638_v19 = vmul.f32 0.03125, %v630_v43 }
 0x2bf   : > { %v557_v44 = vmul.f32 %v1493_v26, %v525_v6 }
 0x2c0   : > { %v947_v1 = vpop.eup %946  ;;  %v642_v7 = vadd.f32 1e-05, %v638_v19 }
 0x2c1   : > { %562 = vst.msk [vmem:[%s1497_s30 + $0x2] sm:$0x3] %vm560_vm2, %v557_v44  ;;  %v526_v8 = vmul.f32 %v947_v1, %v1444_v4  ;;  %v633_v47 = vpop.xlane.xlu0 %632 }
 0x2c2   : > { %952 = vrsqrt.f32 %v642_v7  ;;  %v639_v9 = vmul.f32 0.03125, %v633_v47 }
 0x2c3   : > { %v558_v49 = vmul.f32 %v1503_v29, %v526_v8 }
 0x2c4   : > { %v949_v10 = vpop.eup %948  ;;  %v643_v50 = vadd.f32 1e-05, %v639_v9 }
 0x2c5   : > { %563 = vst.msk [vmem:[%s1497_s30 + $0x4] sm:$0x3] %vm560_vm2, %v558_v49  ;;  %v527_v2 = vmul.f32 %v949_v10, %v1450_v41  ;;  %v636_v51 = vpop.xlane.xlu0 %635 }
 0x2c6   : > { %954 = vrsqrt.f32 %v643_v50  ;;  %v640_v52 = vmul.f32 0.03125, %v636_v51 }
 0x2c7   : > { %v559_v53 = vmul.f32 %v1510_v3, %v527_v2 }
 0x2c8   : > { %v951_v4 = vpop.eup %950  ;;  %v644_v54 = vadd.f32 1e-05, %v640_v52 }
 0x2c9   : > { %564 = vst.msk [vmem:[%s1497_s30 + $0x6] sm:$0x3] %vm560_vm2, %v559_v53  ;;  %v649_v55 = vmul.f32 %v951_v4, %v1456_v42 }
 0x2ca   : > { %956 = vrsqrt.f32 %v644_v54 }
 0x2cb   : > { %v681_v11 = vmul.f32 %v1487_v18, %v649_v55 }
 0x2cc   : > { %v953_v41 = vpop.eup %952 }
 0x2cd   : > { %v650_v56 = vmul.f32 %v953_v41, %v1462_v45  ;;  %686 = vst.msk [vmem:[%s1497_s30] sm:$0x3] %vm685_vm3, %v681_v11 }
 0x2cf   : > { %v682_v57 = vmul.f32 %v1493_v26, %v650_v56 }
 0x2d0   : > { %v955_v59 = vpop.eup %954 }
 0x2d1   : > { %v651_v60 = vmul.f32 %v955_v59, %v1468_v46  ;;  %687 = vst.msk [vmem:[%s1497_s30 + $0x2] sm:$0x3] %vm685_vm3, %v682_v57 }
 0x2d3   : > { %v683_v42 = vmul.f32 %v1503_v29, %v651_v60 }
 0x2d4   : > { %v957_v61 = vpop.eup %956 }
 0x2d5   : > { %v652_v18 = vmul.f32 %v957_v61, %v1475_v48  ;;  %688 = vst.msk [vmem:[%s1497_s30 + $0x4] sm:$0x3] %vm685_vm3, %v683_v42 }
 0x2d7   : > { %v684_v45 = vmul.f32 %v1510_v3, %v652_v18 }
 0x2d9   : > { %689 = vst.msk [vmem:[%s1497_s30 + $0x6] sm:$0x3] %vm685_vm3, %v684_v45 }
 0x2da   : > { %1031 = shalt.err (!%p1028_p9)
}
 0x2db   : > { %s1032_s29 = scalar_lea.hbm %s1577_s18, 128  ;;  %s1036_s15 = scalar_lea.hbm %s1635_s2, 256 }
 0x2dc   : > { %p1033_p1 = scmp.ne.s32.totalorder %s1577_s18, %s1032_s29  ;;  %p1037_p5 = scmp.lt.u32.totalorder %s1577_s18, %s1635_s2 }
 0x2dd   : > { %p1038_p4 = scmp.lt.u32.totalorder %s1036_s15, %s1032_s29  ;;  %p1040_p0 = scmp.lt.u32.totalorder %s1032_s29, %s1577_s18 }
 0x2de   : > { %p1034_p6 = pnand %p1033_p1, %p1646_p3 }
 0x2df   : > { %p1039_p8 = por %p1038_p4, %p1037_p5 }
 0x2e0   : > { %p1035_p2 = pneg %p1034_p6 }
 0x2e1   : > { %p1041_p11 = por %p1040_p0, %p1039_p8 }
 0x2e3   : > { %p1042_p13 = pnand %p1041_p11, %p1035_p2 }
 0x2e5   : > { %1045 = shalt.err (!%p1042_p13)
}
 0x2e6   : > { %s1116_s30 = smov 2  }
 0x2e7   : > { %855 = dma.vmem_to_hbm [thread:$0]  (%p1646_p3), %s1580_s7, 128, %s1577_s18, %s691_s12, %s1114_s26, %s1114_s26, %s1116_s30  }
 0x2e8 PF: > { %s720_s3 = sand.u32 1, %s1084_s9   ;;  %p1647_p7 = scmp.ne.s32.totalorder %s1641_s24, 0 }
 0x2e9   : > { %p1648_p10 = scmp.ge.s32.totalorder %s1104_s14, 2  ;;  %s721_s8 = scalar_lea.sflag [#allocation4], %s720_s3 }
 0x2eb   : > { %p865_p12 = pnand %p1648_p10, %p1647_p7 }
 0x2ed   : > { %1079 = dma.done.wait (!%p865_p12), %s721_s8, 128  }
 0x2ee   : > { %1081 = vsyncadd (!%p865_p12), %s721_s8, 4294967168  ;;  %s21_s14 = sadd.s32 1, %s1104_s14   ;;  %s1649_s9 = smov %s1088_s10 }
 0x2ef   : > { %p18_p9 = scmp.ge.s32.totalorder %s21_s14, 4   ;;  %s1650_s10 = smov %s1092_s11 }
 0x2f0   : > { %s1651_s11 = smov %s1188_s23  ;;  %s1652_s12 = smov %s1100_s13 }
 0x2f1   : > { %s1653_s13 = smov %s1655_s17  ;;  %20 = sbr.rel (!%p18_p9) target bundleno = 8 (0x8), region = 86 }
 0x2f8   :  { %726 = vsyncpa [#allocation3], 1 }
 0x2f9   :  { %728 = vsyncpa [#allocation3 + $0x1], 1 }
 0x2fa   :  { %729 = vsyncpa [#allocation6], 1 }
 0x2fb   :  { %731 = vsyncpa [#allocation6 + $0x1], 1 }
 0x2fc   :  { %732 = vsyncpa [#allocation4], 1 }
 0x2fd   :  { %734 = vsyncpa [#allocation4 + $0x1], 1 }

</bundles_post_ra>
